<compile_context>
chip_gen: v5e
topology: v5e:2x2
jax: 0.10.0
libtpu: 0.0.40
codegen_flags: <defaults>
</compile_context>

<pallas_src>
import jax
import jax.numpy as jnp
from jax.experimental import pallas as pl
from jax.experimental.pallas import tpu as pltpu

LOG_STD_MAX = 2.0
LOG_STD_MIN = -20.0

_LOG2 = float(jnp.log(2.0))
_HALF_LOG_2PI = float(0.5 * jnp.log(2.0 * jnp.pi))
# |a| above which log(1 - tanh(a)^2) switches to its asymptotic form
# 2*(log2 - |a|); at the crossover both forms agree to ~2.5e-4.
_TANH_CORR_SWITCH = 4.5


def _round_up(n, m):
    return ((n + m - 1) // m) * m


def _make_actor_kernel(act_dim, act_limit):
    def actor_kernel(obs_ref, noise_ref, w1_ref, b1_ref, w2_ref, b2_ref,
                     wh_ref, bh_ref, pi_ref, logp_ref):
        x = obs_ref[...]                 # compute dtype (f32 or bf16)
        noise = noise_ref[...]           # f32

        # --- PGMLP trunk: two Linear layers, ReLU on every layer.
        # f32 accumulation; bias add / ReLU stay f32 (v5e has no bf16 VPU) and
        # only the dot operands are cast to the weight dtype.
        h = jnp.dot(x, w1_ref[...], preferred_element_type=jnp.float32) + b1_ref[...]
        h = jnp.maximum(h, 0.0).astype(w2_ref.dtype)
        h = jnp.dot(h, w2_ref[...], preferred_element_type=jnp.float32) + b2_ref[...]
        h = jnp.maximum(h, 0.0).astype(wh_ref.dtype)

        # --- fused mu / log_std heads: one MXU pass, split columns after.
        heads = jnp.dot(h, wh_ref[...], preferred_element_type=jnp.float32) + bh_ref[...]
        mu = heads[:, :act_dim]
        log_std = jnp.clip(heads[:, act_dim:], LOG_STD_MIN, LOG_STD_MAX)
        std = jnp.exp(log_std)

        # --- reparameterized sample (rsample).
        a = mu + std * noise

        # --- Normal log-prob at its own sample: (a - mu)/std == noise exactly.
        log_prob = -0.5 * noise * noise - log_std - _HALF_LOG_2PI

        # --- tanh-squash correction: 2*(log2 - a - softplus(-2a)) ==
        # log(1 - tanh(a)^2).  Reuse the tanh needed for pi (1 EUP op instead
        # of exp+log); use the asymptotic form where 1 - tanh^2 would
        # cancel/underflow (|a| large).
        t = jnp.tanh(a)
        abs_a = jnp.abs(a)
        one_m_t2 = jnp.maximum(1.0 - t * t, 1e-30)
        corr = jnp.where(abs_a < _TANH_CORR_SWITCH,
                         jnp.log(one_m_t2),
                         2.0 * (_LOG2 - abs_a))

        logp = jnp.sum(log_prob - corr, axis=-1, keepdims=True)   # (bm, 1)

        # --- epilogue: exactly one full-block store per output.
        pi_ref[...] = (act_limit * t).astype(pi_ref.dtype)
        logp_ref[...] = logp.astype(logp_ref.dtype)

    return actor_kernel


def prepare_actor_params(params, *, use_bf16=True):
    """One-time parameter prep, hoisted out of the per-call hot path:
    fuse the mu / log_std heads into one (h2, 2*act_dim) weight and cast the
    matmul weights to the compute dtype.  Biases stay f32 -- they add into the
    f32 accumulator anyway."""
    wdt = jnp.bfloat16 if use_bf16 else jnp.float32
    wh = jnp.concatenate([params["wmu"], params["wls"]], axis=1)
    bh = jnp.concatenate([params["bmu"], params["bls"]], axis=1)
    return (params["w1"].astype(wdt),
            params["b1"].astype(jnp.float32),
            params["w2"].astype(wdt),
            params["b2"].astype(jnp.float32),
            wh.astype(wdt),
            bh.astype(jnp.float32))


def squashed_gaussian_actor(obs, noise, prepared_params, act_limit,
                            *, block_rows=512, core_parallel=False):
    """Full actor forward as one batch-tiled Pallas call.

    prepared_params: output of prepare_actor_params().
    Returns (pi_action, logp_pi) with shapes (B, act_dim) and (B,).
    core_parallel=True forces the batch grid axis onto both v7x TensorCores.
    """
    w1, b1, w2, b2, wh, bh = prepared_params
    compute_dtype = w1.dtype
    obs = jnp.asarray(obs).astype(compute_dtype)
    noise = jnp.asarray(noise, jnp.float32)

    B, obs_dim = obs.shape
    act_dim = wh.shape[1] // 2
    h1 = w1.shape[1]
    h2 = w2.shape[1]

    # Batch tile: multiple of 8 sublanes; pad rows so the grid divides evenly.
    bm = min(block_rows, _round_up(B, 8))
    b_pad = _round_up(B, bm)
    if b_pad != B:
        obs = jnp.pad(obs, ((0, b_pad - B), (0, 0)))
        noise = jnp.pad(noise, ((0, b_pad - B), (0, 0)))

    grid = (b_pad // bm,)
    w_args = (w1, b1, w2, b2, wh, bh)

    def resident(a):
        # Weights/biases: full-array block with a constant index_map ->
        # fetched once, VMEM-resident across all batch tiles.
        # NOTE: for large hidden sizes on v7x (64 MiB VMEM), consider
        # pipeline_mode=pl.Buffered(1) on these specs (they are fetched once)
        # or K-tiling the trunk matmuls.
        return pl.BlockSpec(a.shape, lambda i: (0,) * a.ndim)

    flops = 2 * b_pad * (obs_dim * h1 + h1 * h2 + h2 * 2 * act_dim)
    transcendentals = 3 * b_pad * act_dim            # exp(log_std), tanh, log
    bytes_accessed = int(
        obs.size * obs.dtype.itemsize
        + noise.size * 4
        + sum(int(a.size) * a.dtype.itemsize for a in w_args)
        + b_pad * (act_dim + 1) * 4)

    dim_sem = (pltpu.CORE_PARALLEL,) if core_parallel else ("parallel",)

    pi_pad, logp_pad = pl.pallas_call(
        _make_actor_kernel(act_dim, float(act_limit)),
        out_shape=(jax.ShapeDtypeStruct((b_pad, act_dim), jnp.float32),
                   jax.ShapeDtypeStruct((b_pad, 1), jnp.float32)),
        grid=grid,
        in_specs=[pl.BlockSpec((bm, obs_dim), lambda i: (i, 0)),   # obs tile
                  pl.BlockSpec((bm, act_dim), lambda i: (i, 0))]   # noise tile
                 + [resident(a) for a in w_args],
        out_specs=(pl.BlockSpec((bm, act_dim), lambda i: (i, 0)),
                   pl.BlockSpec((bm, 1), lambda i: (i, 0))),
        compiler_params=pltpu.CompilerParams(
            dimension_semantics=dim_sem,
            vmem_limit_bytes=32 << 20,
        ),
        cost_estimate=pl.CostEstimate(flops=flops,
                                      transcendentals=transcendentals,
                                      bytes_accessed=bytes_accessed),
    )(obs, noise, *w_args)

    return pi_pad[:B], logp_pad[:B, 0]


def init_params(key, obs_dim, hidden_sizes, act_dim):
    """Deterministic synthetic parameter init (matches nn.Linear shapes,
    stored transposed as (in_features, out_features))."""
    h1, h2 = hidden_sizes
    ks = jax.random.split(key, 8)
    scale = 0.1
    return {
        "w1": scale * jax.random.normal(ks[0], (obs_dim, h1), jnp.float32),
        "b1": scale * jax.random.normal(ks[1], (1, h1), jnp.float32),
        "w2": scale * jax.random.normal(ks[2], (h1, h2), jnp.float32),
        "b2": scale * jax.random.normal(ks[3], (1, h2), jnp.float32),
        "wmu": scale * jax.random.normal(ks[4], (h2, act_dim), jnp.float32),
        "bmu": scale * jax.random.normal(ks[5], (1, act_dim), jnp.float32),
        "wls": scale * jax.random.normal(ks[6], (h2, act_dim), jnp.float32),
        "bls": scale * jax.random.normal(ks[7], (1, act_dim), jnp.float32),
    }


if __name__ == "__main__":
    batch = 50                 # not a multiple of the tile -> exercises padding
    obs_dim = 16
    hidden_sizes = (32, 32)
    act_dim = 8
    act_limit = 1.5

    key = jax.random.PRNGKey(0)
    k_param, k_obs, k_noise = jax.random.split(key, 3)

    params = init_params(k_param, obs_dim, hidden_sizes, act_dim)
    obs = jax.random.normal(k_obs, (batch, obs_dim), jnp.float32)
    noise = jax.random.normal(k_noise, (batch, act_dim), jnp.float32)  # rsample eps

    # Pure-JAX reference (mirrors the PyTorch forward, softplus form).
    h = jnp.maximum(obs @ params["w1"] + params["b1"], 0.0)
    h = jnp.maximum(h @ params["w2"] + params["b2"], 0.0)
    mu = h @ params["wmu"] + params["bmu"]
    log_std = jnp.clip(h @ params["wls"] + params["bls"], LOG_STD_MIN, LOG_STD_MAX)
    std = jnp.exp(log_std)
    a = mu + std * noise
    ref_logp = jnp.sum(-0.5 * ((a - mu) / std) ** 2 - log_std
                       - 0.5 * jnp.log(2.0 * jnp.pi), axis=-1)
    ref_logp -= jnp.sum(2.0 * (jnp.log(2.0) - a - jnp.logaddexp(0.0, -2.0 * a)), axis=-1)
    ref_pi = act_limit * jnp.tanh(a)

    # f32 parity path; block_rows=16 -> grid=(4,) exercises the batch pipeline.
    prepared_f32 = prepare_actor_params(params, use_bf16=False)
    pi_f32, logp_f32 = squashed_gaussian_actor(obs, noise, prepared_f32, act_limit,
                                               block_rows=16)
    jax.block_until_ready((pi_f32, logp_f32))
    assert pi_f32.shape == (batch, act_dim)
    assert logp_f32.shape == (batch,)
    assert jnp.allclose(pi_f32, ref_pi, atol=1e-5, rtol=1e-5)
    assert jnp.allclose(logp_f32, ref_logp, atol=1e-3, rtol=1e-4)

    # Default production path: bf16 weight/obs streaming, block_rows=512.
    prepared = prepare_actor_params(params)            # use_bf16=True
    pi_bf16, logp_bf16 = squashed_gaussian_actor(obs, noise, prepared, act_limit)
    jax.block_until_ready((pi_bf16, logp_bf16))
    assert bool(jnp.all(jnp.isfinite(pi_bf16)))
    assert bool(jnp.all(jnp.isfinite(logp_bf16)))
    assert jnp.allclose(pi_bf16, ref_pi, atol=0.1, rtol=0.05)
    assert jnp.allclose(logp_bf16, ref_logp, atol=0.5, rtol=0.05)

    print("KERNEL_OK")
</pallas_src>

<mosaic_0001>
module attributes {stable_mosaic.version = 11 : i64} {
  func.func @actor_kernel(%arg0: i32, %arg1: memref<16x16xf32, #tpu.memory_space<vmem>>, %arg2: memref<16x8xf32, #tpu.memory_space<vmem>>, %arg3: memref<16x32xf32, #tpu.memory_space<vmem>>, %arg4: memref<1x32xf32, #tpu.memory_space<vmem>>, %arg5: memref<32x32xf32, #tpu.memory_space<vmem>>, %arg6: memref<1x32xf32, #tpu.memory_space<vmem>>, %arg7: memref<32x16xf32, #tpu.memory_space<vmem>>, %arg8: memref<1x16xf32, #tpu.memory_space<vmem>>, %arg9: memref<16x8xf32, #tpu.memory_space<vmem>>, %arg10: memref<16x1xf32, #tpu.memory_space<vmem>>) attributes {dimension_semantics = [#tpu.dimension_semantics<parallel>], iteration_bounds = array<i64: 4>, scalar_prefetch = 0 : i64, scratch_operands = 0 : i64, tpu.core_type = #tpu.core_type<tc>, window_params = [{transform_indices = @transform_0, window_bounds = array<i64: 16, 16>}, {transform_indices = @transform_1, window_bounds = array<i64: 16, 8>}, {pipeline_mode = #tpu.pipeline_mode<synchronous>, transform_indices = @transform_2, window_bounds = array<i64: 16, 32>}, {pipeline_mode = #tpu.pipeline_mode<synchronous>, transform_indices = @transform_3, window_bounds = array<i64: 1, 32>}, {pipeline_mode = #tpu.pipeline_mode<synchronous>, transform_indices = @transform_4, window_bounds = array<i64: 32, 32>}, {pipeline_mode = #tpu.pipeline_mode<synchronous>, transform_indices = @transform_5, window_bounds = array<i64: 1, 32>}, {pipeline_mode = #tpu.pipeline_mode<synchronous>, transform_indices = @transform_6, window_bounds = array<i64: 32, 16>}, {pipeline_mode = #tpu.pipeline_mode<synchronous>, transform_indices = @transform_7, window_bounds = array<i64: 1, 16>}, {transform_indices = @transform_8, window_bounds = array<i64: 16, 8>}, {transform_indices = @transform_9, window_bounds = array<i64: 16, 1>}]} {
    %c0 = arith.constant 0 : index
    %c0_0 = arith.constant 0 : index
    %0 = vector.load %arg1[%c0, %c0_0] : memref<16x16xf32, #tpu.memory_space<vmem>>, vector<16x16xf32>
    %c0_1 = arith.constant 0 : index
    %c0_2 = arith.constant 0 : index
    %1 = vector.load %arg2[%c0_1, %c0_2] : memref<16x8xf32, #tpu.memory_space<vmem>>, vector<16x8xf32>
    %c0_3 = arith.constant 0 : index
    %c0_4 = arith.constant 0 : index
    %2 = vector.load %arg3[%c0_3, %c0_4] : memref<16x32xf32, #tpu.memory_space<vmem>>, vector<16x32xf32>
    %cst = arith.constant dense<0.000000e+00> : vector<16x32xf32>
    %3 = tpu.matmul %0, %2, %cst {dimension_numbers = #tpu.dot_dimension_numbers<[1], [0], [0], [1], [0, 0, 1, 1], [], []>} : vector<16x16xf32>, vector<16x32xf32>, vector<16x32xf32> -> vector<16x32xf32>
    %c0_5 = arith.constant 0 : index
    %c0_6 = arith.constant 0 : index
    %4 = vector.load %arg4[%c0_5, %c0_6] : memref<1x32xf32, #tpu.memory_space<vmem>>, vector<1x32xf32>
    %5 = vector.broadcast %4 : vector<1x32xf32> to vector<16x32xf32>
    %6 = arith.addf %3, %5 : vector<16x32xf32>
    %cst_7 = arith.constant 0.000000e+00 : f32
    %7 = vector.broadcast %cst_7 : f32 to vector<16x32xf32>
    %8 = arith.maximumf %6, %7 : vector<16x32xf32>
    %c0_8 = arith.constant 0 : index
    %c0_9 = arith.constant 0 : index
    %9 = vector.load %arg5[%c0_8, %c0_9] : memref<32x32xf32, #tpu.memory_space<vmem>>, vector<32x32xf32>
    %cst_10 = arith.constant dense<0.000000e+00> : vector<16x32xf32>
    %10 = tpu.matmul %8, %9, %cst_10 {dimension_numbers = #tpu.dot_dimension_numbers<[1], [0], [0], [1], [0, 0, 1, 1], [], []>} : vector<16x32xf32>, vector<32x32xf32>, vector<16x32xf32> -> vector<16x32xf32>
    %c0_11 = arith.constant 0 : index
    %c0_12 = arith.constant 0 : index
    %11 = vector.load %arg6[%c0_11, %c0_12] : memref<1x32xf32, #tpu.memory_space<vmem>>, vector<1x32xf32>
    %12 = vector.broadcast %11 : vector<1x32xf32> to vector<16x32xf32>
    %13 = arith.addf %10, %12 : vector<16x32xf32>
    %cst_13 = arith.constant 0.000000e+00 : f32
    %14 = vector.broadcast %cst_13 : f32 to vector<16x32xf32>
    %15 = arith.maximumf %13, %14 : vector<16x32xf32>
    %c0_14 = arith.constant 0 : index
    %c0_15 = arith.constant 0 : index
    %16 = vector.load %arg7[%c0_14, %c0_15] : memref<32x16xf32, #tpu.memory_space<vmem>>, vector<32x16xf32>
    %cst_16 = arith.constant dense<0.000000e+00> : vector<16x16xf32>
    %17 = tpu.matmul %15, %16, %cst_16 {dimension_numbers = #tpu.dot_dimension_numbers<[1], [0], [0], [1], [0, 0, 1, 1], [], []>} : vector<16x32xf32>, vector<32x16xf32>, vector<16x16xf32> -> vector<16x16xf32>
    %c0_17 = arith.constant 0 : index
    %c0_18 = arith.constant 0 : index
    %18 = vector.load %arg8[%c0_17, %c0_18] : memref<1x16xf32, #tpu.memory_space<vmem>>, vector<1x16xf32>
    %19 = vector.broadcast %18 : vector<1x16xf32> to vector<16x16xf32>
    %20 = arith.addf %17, %19 : vector<16x16xf32>
    %21 = vector.extract_strided_slice %20 {offsets = [0, 0], sizes = [16, 8], strides = [1, 1]} : vector<16x16xf32> to vector<16x8xf32>
    %22 = vector.extract_strided_slice %20 {offsets = [0, 8], sizes = [16, 8], strides = [1, 1]} : vector<16x16xf32> to vector<16x8xf32>
    %cst_19 = arith.constant -2.000000e+01 : f32
    %cst_20 = arith.constant 2.000000e+00 : f32
    %23 = vector.broadcast %cst_19 : f32 to vector<16x8xf32>
    %24 = arith.maximumf %23, %22 : vector<16x8xf32>
    %25 = vector.broadcast %cst_20 : f32 to vector<16x8xf32>
    %26 = arith.minimumf %25, %24 : vector<16x8xf32>
    %27 = math.exp %26 : vector<16x8xf32>
    %28 = arith.mulf %27, %1 : vector<16x8xf32>
    %29 = arith.addf %21, %28 : vector<16x8xf32>
    %cst_21 = arith.constant -5.000000e-01 : f32
    %30 = vector.broadcast %cst_21 : f32 to vector<16x8xf32>
    %31 = arith.mulf %30, %1 : vector<16x8xf32>
    %32 = arith.mulf %31, %1 : vector<16x8xf32>
    %33 = arith.subf %32, %26 : vector<16x8xf32>
    %cst_22 = arith.constant 0.918938517 : f32
    %34 = vector.broadcast %cst_22 : f32 to vector<16x8xf32>
    %35 = arith.subf %33, %34 : vector<16x8xf32>
    %36 = math.tanh %29 : vector<16x8xf32>
    %37 = math.absf %29 : vector<16x8xf32>
    %38 = arith.mulf %36, %36 : vector<16x8xf32>
    %cst_23 = arith.constant 1.000000e+00 : f32
    %39 = vector.broadcast %cst_23 : f32 to vector<16x8xf32>
    %40 = arith.subf %39, %38 : vector<16x8xf32>
    %cst_24 = arith.constant 1.000000e-30 : f32
    %41 = vector.broadcast %cst_24 : f32 to vector<16x8xf32>
    %42 = arith.maximumf %40, %41 : vector<16x8xf32>
    %cst_25 = arith.constant 4.500000e+00 : f32
    %43 = vector.broadcast %cst_25 : f32 to vector<16x8xf32>
    %44 = arith.cmpf olt, %37, %43 : vector<16x8xf32>
    %45 = math.log %42 : vector<16x8xf32>
    %cst_26 = arith.constant 0.693147182 : f32
    %46 = vector.broadcast %cst_26 : f32 to vector<16x8xf32>
    %47 = arith.subf %46, %37 : vector<16x8xf32>
    %cst_27 = arith.constant 2.000000e+00 : f32
    %48 = vector.broadcast %cst_27 : f32 to vector<16x8xf32>
    %49 = arith.mulf %48, %47 : vector<16x8xf32>
    %50 = arith.select %44, %45, %49 : vector<16x8xi1>, vector<16x8xf32>
    %51 = arith.subf %35, %50 : vector<16x8xf32>
    %cst_28 = arith.constant dense<0.000000e+00> : vector<16xf32>
    %52 = vector.multi_reduction <add>, %51, %cst_28 [1] : vector<16x8xf32> to vector<16xf32>
    %53 = vector.shape_cast %52 : vector<16xf32> to vector<16x1xf32>
    %cst_29 = arith.constant 1.500000e+00 : f32
    %54 = vector.broadcast %cst_29 : f32 to vector<16x8xf32>
    %55 = arith.mulf %54, %36 : vector<16x8xf32>
    %c0_30 = arith.constant 0 : index
    %c0_31 = arith.constant 0 : index
    %56 = vector.load %arg9[%c0_30, %c0_31] : memref<16x8xf32, #tpu.memory_space<vmem>>, vector<16x8xf32>
    tpu.vector_store %arg9[%c0_30, %c0_31], %55 {strides = array<i32>} : memref<16x8xf32, #tpu.memory_space<vmem>>, vector<16x8xf32>,
    %c0_32 = arith.constant 0 : index
    %c0_33 = arith.constant 0 : index
    %57 = vector.load %arg10[%c0_32, %c0_33] : memref<16x1xf32, #tpu.memory_space<vmem>>, vector<16x1xf32>
    tpu.vector_store %arg10[%c0_32, %c0_33], %53 {strides = array<i32>} : memref<16x1xf32, #tpu.memory_space<vmem>>, vector<16x1xf32>,
    return
  }
  func.func @transform_0(%arg0: i32) -> (i32, i32) {
    %c0_i32 = arith.constant 0 : i32
    %c0_i32_0 = arith.constant 0 : i32
    return %arg0, %c0_i32 : i32, i32
  }
  func.func @transform_1(%arg0: i32) -> (i32, i32) {
    %c0_i32 = arith.constant 0 : i32
    %c0_i32_0 = arith.constant 0 : i32
    return %arg0, %c0_i32 : i32, i32
  }
  func.func @transform_2(%arg0: i32) -> (i32, i32) {
    %c0_i32 = arith.constant 0 : i32
    %c0_i32_0 = arith.constant 0 : i32
    %c0_i32_1 = arith.constant 0 : i32
    return %c0_i32, %c0_i32_0 : i32, i32
  }
  func.func @transform_3(%arg0: i32) -> (i32, i32) {
    %c0_i32 = arith.constant 0 : i32
    %c0_i32_0 = arith.constant 0 : i32
    %c0_i32_1 = arith.constant 0 : i32
    return %c0_i32, %c0_i32_0 : i32, i32
  }
  func.func @transform_4(%arg0: i32) -> (i32, i32) {
    %c0_i32 = arith.constant 0 : i32
    %c0_i32_0 = arith.constant 0 : i32
    %c0_i32_1 = arith.constant 0 : i32
    return %c0_i32, %c0_i32_0 : i32, i32
  }
  func.func @transform_5(%arg0: i32) -> (i32, i32) {
    %c0_i32 = arith.constant 0 : i32
    %c0_i32_0 = arith.constant 0 : i32
    %c0_i32_1 = arith.constant 0 : i32
    return %c0_i32, %c0_i32_0 : i32, i32
  }
  func.func @transform_6(%arg0: i32) -> (i32, i32) {
    %c0_i32 = arith.constant 0 : i32
    %c0_i32_0 = arith.constant 0 : i32
    %c0_i32_1 = arith.constant 0 : i32
    return %c0_i32, %c0_i32_0 : i32, i32
  }
  func.func @transform_7(%arg0: i32) -> (i32, i32) {
    %c0_i32 = arith.constant 0 : i32
    %c0_i32_0 = arith.constant 0 : i32
    %c0_i32_1 = arith.constant 0 : i32
    return %c0_i32, %c0_i32_0 : i32, i32
  }
  func.func @transform_8(%arg0: i32) -> (i32, i32) {
    %c0_i32 = arith.constant 0 : i32
    %c0_i32_0 = arith.constant 0 : i32
    return %arg0, %c0_i32 : i32, i32
  }
  func.func @transform_9(%arg0: i32) -> (i32, i32) {
    %c0_i32 = arith.constant 0 : i32
    %c0_i32_0 = arith.constant 0 : i32
    return %arg0, %c0_i32 : i32, i32
  }
}

</mosaic_0001>

<bundles_post_ra>
// kernel: tpu_custom_call.1
= control target key start
LH: loop header
LB: loop body
LE: loop exit
PB: predicated region body
PF: predicated region fallthrough
CT: control target
= control target key end

     0   :  { %s787_s30 = smov 0   ;;  %s868_s0 = inlined_call_operand.vmem [shape: f32[64,16], index: 0, kind: input, shape index: {}]   ;;  %s869_s1 = inlined_call_operand.vmem [shape: f32[64,8], index: 1, kind: input, shape index: {}]   ;;  %s870_s2 = inlined_call_operand.vmem [shape: f32[16,32], index: 2, kind: input, shape index: {}]   ;;  %s871_s3 = inlined_call_operand.vmem [shape: f32[1,32], index: 3, kind: input, shape index: {}]   ;;  %s872_s4 = inlined_call_operand.vmem [shape: f32[32,32], index: 4, kind: input, shape index: {}]   ;;  %s873_s5 = inlined_call_operand.vmem [shape: f32[1,32], index: 5, kind: input, shape index: {}]   ;;  %s874_s6 = inlined_call_operand.vmem [shape: f32[32,16], index: 6, kind: input, shape index: {}]   ;;  %s875_s7 = inlined_call_operand.vmem [shape: f32[1,16], index: 7, kind: input, shape index: {}]   ;;  %s876_s8 = inlined_call_operand.vmem [shape: f32[64,8], index: 8, kind: output, shape index: {0}]   ;;  %s877_s9 = inlined_call_operand.vmem [shape: f32[64,1], index: 9, kind: output, shape index: {1}]  }
   0x1 LB: > { %s675_s10 = sadd.s32 4294967295, %s733_s30   ;;  %p679_p0 = scmp.ge.s32.totalorder %s733_s30, 1  ;;  %s733_s30 = sphi %s787_s30, %s20_s30  }
   0x2   : > { %p302_p1 = scmp.lt.s32.totalorder %s733_s30, 5 }
   0x4   : > { %p303_p2 = pnand %p679_p0, %p302_p1 }
   0x5   : > { %s680_s15 = sshll.u32 (!%p303_p2), %s675_s10, 1  ;;  %s735_s22 = smov (!%p303_p2), 8  }
   0x6   : > { %306 = sbr.rel (%p303_p2) target bundleno = 698 (0x2ba), region = 52  ;;  %p349_p3 = scmp.lt.s32.totalorder (!%p303_p2), %s680_s15, 7 }
   0x7   : > { %s736_s27 = smov (!%p303_p2), 120  }
   0xb   : > { %v377_v0 = vld [vmem:[%s870_s2 + $0x8] sm:$0xff]  ;;  %v376_v1 = vld [vmem:[%s870_s2] sm:$0xff]  ;;  %v417_v2 = vld [vmem:[%s872_s4 + $0x18] sm:$0xff]  ;;  %s879_s15 = smov (!%p349_p3, %s680_s15), 7  ;;  %vm382_vm0 = vcmask 130048   ;;  %vm422_vm1 = vcmask 261120  }
   0xc   : > { %403 = vmatpush.msra.mxu0 %v377_v0  ;;  %441 = vmatpush.msra.mxu1 %v417_v2  ;;  %s804_s18 = sshll.u32 %s879_s15, 3  ;;  %v416_v5 = vld [vmem:[%s872_s4 + $0x10] sm:$0xff]  ;;  %v415_v6 = vld [vmem:[%s872_s4 + $0x8] sm:$0xff]  ;;  %v414_v7 = vld [vmem:[%s872_s4] sm:$0xff]  ;;  %vm559_vm2 = vcmask 64512   ;;  %vm570_vm5 = vcmask 7168  }
   0xd   : > { %698 = vmatpush.msra.mxu3 %v417_v2  ;;  %s352_s21 = scalar_lea.vmem %s868_s0, %s804_s18  ;;  %v457_v8 = vld [vmem:[%s874_s6 + $0x18] sm:$0xff]  ;;  %v712_v9 = vld [vmem:[%s871_s3] ss:$0 sm:$0xff]  ;;  %v456_v16 = vld [vmem:[%s874_s6 + $0x10] sm:$0xff]  ;;  %s364_s10 = scalar_lea.vmem %s876_s8, %s804_s18 }
   0xe   : > { %404 = vmatpush.msra.mxu0 %v376_v1  ;;  %v372_v3 = vld [vmem:[%s352_s21] sm:$0xff]  ;;  %v373_v4 = vld [vmem:[%s352_s21 + $0x8] sm:$0xff]  ;;  %442 = vmatpush.msra.mxu1 %v416_v5  ;;  %s358_s21 = scalar_lea.vmem %s869_s1, %s804_s18  ;;  %s370_s13 = scalar_lea.vmem %s877_s9, %s804_s18 }
   0xf   : > { %688 = vmatmul.msk.f32.vlgmr.msra.gmra.mxu0 %vm382_vm0, %v372_v3  ;;  %699 = vmatpush.msra.mxu3 %v416_v5  ;;  %v455_v17 = vld [vmem:[%s874_s6 + $0x8] sm:$0xff]  ;;  %v454_v18 = vld [vmem:[%s874_s6] sm:$0xff] }
  0x10   : > { %443 = vmatpush.msra.mxu1 %v415_v6  ;;  %480 = vmatpush.msra.mxu2 %v457_v8  ;;  %v374_v19 = vld [vmem:[%s358_s21] sm:$0xff]  ;;  %v840_v20 = vld [vmem:[%s358_s21 + $0x8] sm:$0xff] }
  0x11   : > { %700 = vmatpush.msra.mxu3 %v415_v6  ;;  %501 = vrot.lane.b32.xlu0 %v374_v19, %s735_s22  ;;  %v713_v21 = vld [vmem:[%s873_s5] ss:$0 sm:$0xff]  ;;  %v519_v50 = vmul.f32 -0.5, %v374_v19 }
  0x12   : > { %444 = vmatpush.msra.mxu1 %v414_v7  ;;  %481 = vmatpush.msra.mxu2 %v456_v16  ;;  %v714_v28 = vld [vmem:[%s875_s7] ss:$0 sm:$0xff] }
  0x13   : > { %701 = vmatpush.msra.mxu3 %v414_v7  ;;  %v521_v56 = vmul.f32 %v519_v50, %v374_v19 }
  0x14   : > { %482 = vmatpush.msra.mxu2 %v455_v17 }
  0x16   : > { %483 = vmatpush.msra.mxu2 %v454_v18 }
  0x17   : > { %689 = vmatmul.msk.f32.gmra.mxu0 %vm382_vm0, %v373_v4  ;;  %v520_v4 = vmul.f32 -0.5, %v840_v20 }
  0x19   : > { %503 = vrot.lane.b32.xlu0 %v840_v20, %s735_s22 }
  0x83   : > { %v502_v34 = vpop.permute.xlu0 %501 }
  0x8b   : > { %v504_v42 = vpop.permute.xlu0 %503 }
  0x8c   : > { %v406_v10 = vpop.f32.mrf.mxu0 }
  0x8d   : > { %v407_v11 = vadd.f32 %v712_v9, %v406_v10  ;;  %v522_v10 = vmul.f32 %v520_v4, %v840_v20 }
  0x8f   : > { %v412_v12 = vmax.f32 %v407_v11, 0.0 }
  0x91   : > { %690 = vmatmul.msk.f32.vlgmr.msra.gmra.mxu1 %vm422_vm1, %v412_v12 }
  0x94   : > { %v409_v13 = vpop.f32.mrf.mxu0 }
  0x95   : > { %v410_v14 = vadd.f32 %v712_v9, %v409_v13 }
  0x97   : > { %v413_v15 = vmax.f32 %v410_v14, 0.0 }
  0x99   : > { %691 = vmatmul.msk.f32.vlgmr.msra.gmra.mxu3 %vm422_vm1, %v413_v15 }
 0x10e   : > { %v446_v22 = vpop.f32.mrf.mxu1 }
 0x10f   : > { %v447_v23 = vadd.f32 %v713_v21, %v446_v22 }
 0x111   : > { %v452_v24 = vmax.f32 %v447_v23, 0.0 }
 0x113   : > { %692 = vmatmul.msk.f32.vlgmr.msra.gmra.mxu2 %vm422_vm1, %v452_v24 }
 0x11c   : > { %v449_v25 = vpop.f32.mrf.mxu3 }
 0x11d   : > { %v450_v26 = vadd.f32 %v713_v21, %v449_v25 }
 0x11f   : > { %v453_v27 = vmax.f32 %v450_v26, 0.0 }
 0x121   : > { %693 = vmatmul.msk.f32.gmra.mxu2 %vm422_vm1, %v453_v27 }
 0x196   : > { %v485_v29 = vpop.f32.mrf.mxu2 }
 0x197   : > { %v486_v30 = vadd.f32 %v714_v28, %v485_v29 }
 0x199   : > { %v491_v31 = vmax.f32 %v486_v30, -20.0 }
 0x19b   : > { %v493_v32 = vmin.f32 %v491_v31, 2.0 }
 0x19d   : > { %525 = vrot.lane.b32.xlu2 %v493_v32, %s736_s27  ;;  %v495_v33 = vmul.f32 1.442695, %v493_v32 }
 0x19f   : > { %715 = vpow2.f32 %v495_v33 }
 0x1a4   : > { %v488_v35 = vpop.f32.mrf.mxu2 }
 0x1a5   : > { %v716_v36 = vpop.eup %715  ;;  %v489_v37 = vadd.f32 %v714_v28, %v488_v35 }
 0x1a6   : > { %v507_v38 = vmul.f32 %v716_v36, %v502_v34 }
 0x1a7   : > { %v492_v39 = vmax.f32 %v489_v37, -20.0 }
 0x1a8   : > { %511 = vrot.lane.b32.xlu1 %v507_v38, %s736_s27 }
 0x1a9   : > { %v494_v40 = vmin.f32 %v492_v39, 2.0 }
 0x1ab   : > { %v497_v41 = vmul.f32 1.442695, %v494_v40  ;;  %527 = vrot.lane.b32.xlu2 %v494_v40, %s736_s27 }
 0x1ad   : > { %717 = vpow2.f32 %v497_v41 }
 0x1b3   : > { %v718_v43 = vpop.eup %717 }
 0x1b4   : > { %v508_v44 = vmul.f32 %v718_v43, %v504_v42 }
 0x1b6   : > { %513 = vrot.lane.b32.xlu1 %v508_v44, %s736_s27 }
 0x1f7   : > { %v526_v57 = vpop.permute.xlu2 %525 }
 0x1f8   : > { %v531_v59 = vsub.f32 %v521_v56, %v526_v57 }
 0x1fa   : > { %v694_v0 = vadd.f32 -0.9189385, %v531_v59 }
 0x205   : > { %v528_v11 = vpop.permute.xlu2 %527 }
 0x206   : > { %v532_v13 = vsub.f32 %v522_v10, %v528_v11 }
 0x208   : > { %v695_v17 = vadd.f32 -0.9189385, %v532_v13 }
 0x21a   : > { %v512_v45 = vpop.permute.xlu1 %511 }
 0x21b   : > { %v517_v46 = vadd.f32 %v512_v45, %v486_v30 }
 0x21d   : > { %719 = vtanh.f32 %v517_v46  ;;  %v537_v54 = vand.u32 2147483647, %v517_v46 }
 0x21f   : > { %v551_v58 = vsub.f32 0.6931472, %v537_v54  ;;  %vm545_vm3 = vcmp.lt.f32.partialorder %v537_v54, 4.5 }
 0x221   : > { %v553_v62 = vmul.f32 2.0, %v551_v58 }
 0x223   : > { %v720_v47 = vpop.eup %719 }
 0x224   : > { %v539_v48 = vmul.f32 %v720_v47, %v720_v47  ;;  %v566_v49 = vmul.f32 1.5, %v720_v47 }
 0x226   : > { %v541_v51 = vsub.f32 1.0, %v539_v48  ;;  %568 = vst.msk [vmem:[%s364_s10] sm:$0xff] %vm559_vm2, %v566_v49 }
 0x228   : > { %v514_v52 = vpop.permute.xlu1 %513  ;;  %v543_v53 = vmax.f32 %v541_v51, 1e-30 }
 0x229   : > { %v518_v55 = vadd.f32 %v514_v52, %v489_v37 }
 0x22a   : > { %721 = vlog2.f32 %v543_v53 }
 0x22b   : > { %723 = vtanh.f32 %v518_v55  ;;  %v538_v9 = vand.u32 2147483647, %v518_v55 }
 0x22d   : > { %v552_v12 = vsub.f32 0.6931472, %v538_v9  ;;  %vm546_vm4 = vcmp.lt.f32.partialorder %v538_v9, 4.5 }
 0x22f   : > { %v554_v15 = vmul.f32 2.0, %v552_v12 }
 0x230   : > { %v722_v60 = vpop.eup %721 }
 0x231   : > { %v724_v61 = vpop.eup %723  ;;  %v548_v63 = vmul.f32 0.6931472, %v722_v60 }
 0x232   : > { %v540_v1 = vmul.f32 %v724_v61, %v724_v61  ;;  %v567_v2 = vmul.f32 1.5, %v724_v61 }
 0x233   : > { %v555_v3 = vsel %vm545_vm3, %v548_v63, %v553_v62 }
 0x234   : > { %v542_v5 = vsub.f32 1.0, %v540_v1  ;;  %v557_v6 = vsub.f32 %v694_v0, %v555_v3  ;;  %569 = vst.msk [vmem:[%s364_s10 + $0x8] sm:$0xff] %vm559_vm2, %v567_v2 }
 0x236   : > { %v560_v7 = vsel %vm559_vm2, %v557_v6, 0.0  ;;  %v544_v8 = vmax.f32 %v542_v5, 1e-30 }
 0x237   : > { %561 = vadd.xlane.f32.xlu0 %v560_v7 }
 0x238   : > { %725 = vlog2.f32 %v544_v8 }
 0x23e   : > { %v726_v14 = vpop.eup %725 }
 0x23f   : > { %v550_v16 = vmul.f32 0.6931472, %v726_v14 }
 0x241   : > { %v556_v18 = vsel %vm546_vm4, %v550_v16, %v554_v15 }
 0x242   : > { %v558_v19 = vsub.f32 %v695_v17, %v556_v18 }
 0x244   : > { %v563_v21 = vsel %vm559_vm2, %v558_v19, 0.0 }
 0x245   : > { %564 = vadd.xlane.f32.xlu1 %v563_v21 }
 0x2aa   : > { %v562_v20 = vpop.xlane.xlu0 %561 }
 0x2ab   : > { %571 = vst.msk [vmem:[%s370_s13] sm:$0xff] %vm570_vm5, %v562_v20 }
 0x2b8   : > { %v565_v22 = vpop.xlane.xlu1 %564 }
 0x2b9   : > { %572 = vst.msk [vmem:[%s370_s13 + $0x8] sm:$0xff] %vm570_vm5, %v565_v22 }
 0x2ba PF: > { %s20_s30 = sadd.s32 1, %s733_s30  }
 0x2bb   : > { %p17_p4 = scmp.ge.s32.totalorder %s20_s30, 6  }
 0x2bd   :  { %19 = sbr.rel (!%p17_p4) target bundleno = 1 (0x1), region = 97 }

</bundles_post_ra>
